<compile_context>
chip_gen: v7x
topology: tpu7x:2x2x1
jax: 0.10.0
libtpu: 0.0.40
codegen_flags: <defaults>
</compile_context>

<pallas_src>
import functools
import math
import random

import jax
import jax.numpy as jnp
from jax import lax
from jax.experimental import pallas as pl
from jax.experimental.pallas import tpu as pltpu


def _round_up(x, m):
    return ((x + m - 1) // m) * m


def _bev_grid_sample_kernel(sx_ref, sy_ref, feat_ref, out_ref, mt_ref, *, H, W,
                            build_dtype):
    """One (output-tile, bc-tile) grid step.

    sx_ref, sy_ref : VMEM (1, TILE_O) f32       warped normalized sample coords
    feat_ref       : VMEM (TILE_BC, HW_K) bf16  flattened BEV features
    out_ref        : VMEM (TILE_BC, TILE_O)     warped output tile (feat dtype)
    mt_ref         : VMEM (HW_K, TILE_O) bf16   scratch: transposed bilinear
                     interpolation matrix for the current output tile.
    """
    HW_K, TILE_O = mt_ref.shape
    bc_idx = pl.program_id(1)

    # M_T depends only on the warp + output tile (not on BC): build it once
    # per output tile (bc == 0) and reuse it across every BC tile.
    # NOTE: this relies on the bc axis being the innermost, "arbitrary" axis.
    @pl.when(bc_idx == 0)
    def _build_mt():
        sx = sx_ref[...]                              # (1, TILE_O)
        sy = sy_ref[...]
        # grid_sample un-normalization (align_corners=False).
        ix = ((sx + 1.0) * float(W) - 1.0) * 0.5
        iy = ((sy + 1.0) * float(H) - 1.0) * 0.5
        x0f = jnp.floor(ix)
        y0f = jnp.floor(iy)
        wx = ix - x0f
        wy = iy - y0f
        x0 = x0f.astype(jnp.int32)
        y0 = y0f.astype(jnp.int32)

        # padding_mode='zeros': fold per-corner validity into the small
        # (1, TILE_O) weights; everything below the iota is lane-width only.
        def corner_w(dy, dx, wgt):
            xc = x0 + dx
            yc = y0 + dy
            valid = (xc >= 0) & (xc < W) & (yc >= 0) & (yc < H)
            return jnp.where(valid, wgt, 0.0).astype(build_dtype)

        w00 = corner_w(0, 0, (1.0 - wy) * (1.0 - wx))
        w01 = corner_w(0, 1, (1.0 - wy) * wx)
        w10 = corner_w(1, 0, wy * (1.0 - wx))
        w11 = corner_w(1, 1, wy * wx)

        # Input-pixel (contraction) index; slab-sized work is one subtract,
        # 4 compares and 4 selects (no per-corner convert/mul passes).
        row = lax.broadcasted_iota(jnp.int32, (HW_K, TILE_O), 0)
        d = row - (y0 * W + x0)                       # (HW_K, TILE_O)
        zero = jnp.zeros((), build_dtype)
        if W >= 2:
            # offsets {0, 1, W, W+1} are pairwise distinct -> mutually
            # exclusive conditions -> nested selects, no slab adds.
            mt = jnp.where(d == 0, w00,
                 jnp.where(d == 1, w01,
                 jnp.where(d == W, w10,
                 jnp.where(d == W + 1, w11, zero))))
        else:
            # degenerate W == 1: offsets can collide, keep the additive form.
            mt = (jnp.where(d == 0, w00, zero) + jnp.where(d == 1, w01, zero)
                  + jnp.where(d == W, w10, zero)
                  + jnp.where(d == W + 1, w11, zero))
        mt_ref[...] = mt.astype(mt_ref.dtype)

    # Pure MXU inner loop: bf16 operands, f32 accumulation, native (K, N) RHS.
    out_ref[...] = jnp.dot(
        feat_ref[...], mt_ref[...], preferred_element_type=jnp.float32
    ).astype(out_ref.dtype)


def _warp_matrix(rotation_degree, scaling_ratio):
    rad = math.radians(rotation_degree)
    rot = jnp.array(
        [[math.cos(rad), -math.sin(rad), 0.0],
         [math.sin(rad), math.cos(rad), 0.0],
         [0.0, 0.0, 1.0]], dtype=jnp.float32)
    scl = jnp.array(
        [[scaling_ratio, 0.0, 0.0],
         [0.0, scaling_ratio, 0.0],
         [0.0, 0.0, 1.0]], dtype=jnp.float32)
    return (rot @ scl)[:2, :2]


def _chip_defaults():
    """(build_dtype, vmem_capacity_bytes) derived from the attached TPU."""
    build_dtype = jnp.float32
    vmem_cap = 64 * 1024 * 1024          # conservative: v7x per-TC VMEM
    try:
        dk = jax.devices()[0].device_kind.lower()
        # bf16-native VALU only on v6e / v7x; keep the f32 build elsewhere.
        if ("v6" in dk) or ("v7" in dk):
            build_dtype = jnp.bfloat16
    except Exception:
        pass
    try:
        info = pltpu.get_tpu_info()
        vmem_cap = int(getattr(info, "vmem_capacity_bytes", vmem_cap))
    except Exception:
        pass
    return build_dtype, vmem_cap


def bev_warp_pallas(feat, rotation_degree, scaling_ratio, *, tile_o=256,
                    max_tile_bc=None):
    """feat: (B, C, H, W) float (NCHW, same as PyTorch). Returns warped feat."""
    B, C, H, W = feat.shape
    BC, HW = B * C, H * W
    out_dtype = feat.dtype
    build_dtype, vmem_cap = _chip_defaults()

    # ---- output-pixel tiling: lane-dense, and >= 2 grid steps when possible
    #      so the "parallel" axis can shard across v7x's two TensorCores ----
    tile_o = min(tile_o, _round_up(HW, 128))
    if _round_up(HW, tile_o) // tile_o < 2 and tile_o > 128:
        tile_o = max(128, tile_o // 2)
    hw_o = _round_up(HW, tile_o)     # padded output-pixel axis (lane-dense)
    hw_k = _round_up(HW, 128)        # padded contraction (input-pixel) axis
    n_o = hw_o // tile_o

    # ---- tiny O(HW) prep outside the kernel (mirrors the module's own grid
    #      construction + warp application done outside F.grid_sample) ----
    warp = _warp_matrix(rotation_degree, scaling_ratio)
    o_idx = jnp.arange(hw_o, dtype=jnp.int32)
    i_out = (o_idx // W).astype(jnp.float32)
    j_out = (o_idx % W).astype(jnp.float32)
    gx = 2.0 * (j_out + 0.5) / W - 1.0
    gy = 2.0 * (i_out + 0.5) / H - 1.0
    sx = (warp[0, 0] * gx + warp[0, 1] * gy).reshape(1, hw_o)
    sy = (warp[1, 0] * gx + warp[1, 1] * gy).reshape(1, hw_o)

    # ---- batch*channel tiling + VMEM budget ----
    out_bytes = jnp.dtype(out_dtype).itemsize
    mt_bytes = hw_k * tile_o * 2                            # bf16, 1 buffer
    # per BC-row resident bytes: feat (bf16, double-buffered) + out (2 bufs)
    per_row = hw_k * 2 * 2 + tile_o * out_bytes * 2
    budget = int(vmem_cap * 0.7)

    bc_full = _round_up(BC, 16)
    if mt_bytes + bc_full * per_row <= budget:
        # preferred: n_bc == 1 -> feat fetched from HBM exactly once,
        # stays resident in VMEM across all output tiles.
        tile_bc = bc_full
    else:
        tile_bc = 16
        for cand in (512, 256, 128, 64, 32, 16):
            if cand <= bc_full and mt_bytes + cand * per_row <= budget:
                tile_bc = cand
                break
    if max_tile_bc is not None:
        tile_bc = min(tile_bc, max(16, _round_up(int(max_tile_bc), 16)))
    bc_pad = _round_up(BC, tile_bc)
    n_bc = bc_pad // tile_bc

    sxy_bytes = 2 * 2 * (8 * tile_o * 4)                    # sx/sy blocks
    needed = mt_bytes + tile_bc * per_row + sxy_bytes
    vmem_limit = int(min(0.9 * vmem_cap, max(needed + (4 << 20), 16 << 20)))

    feat_flat = feat.reshape(BC, HW).astype(jnp.bfloat16)
    feat_flat = jnp.pad(feat_flat, ((0, bc_pad - BC), (0, hw_k - HW)))

    # NOTE: the bc axis MUST stay the innermost grid axis and "arbitrary":
    # the M_T scratch is built only at bc == 0 and reused for bc = 1..n_bc-1.
    kernel = functools.partial(
        _bev_grid_sample_kernel, H=H, W=W, build_dtype=build_dtype)
    out_flat = pl.pallas_call(
        kernel,
        out_shape=jax.ShapeDtypeStruct((bc_pad, hw_o), out_dtype),
        grid=(n_o, n_bc),
        in_specs=[
            pl.BlockSpec((1, tile_o), lambda o, bc: (0, o)),       # sx
            pl.BlockSpec((1, tile_o), lambda o, bc: (0, o)),       # sy
            pl.BlockSpec((tile_bc, hw_k), lambda o, bc: (bc, 0)),  # feat
        ],
        out_specs=pl.BlockSpec((tile_bc, tile_o), lambda o, bc: (bc, o)),
        scratch_shapes=[pltpu.VMEM((hw_k, tile_o), jnp.bfloat16)],
        compiler_params=pltpu.CompilerParams(
            dimension_semantics=("parallel", "arbitrary"),
            vmem_limit_bytes=vmem_limit,
        ),
    )(sx, sy, feat_flat)

    return out_flat[:BC, :HW].reshape(B, C, H, W)


def bev_random_rotate_scale_forward(
    feat,
    gt_bboxes_3d=None,
    gt_labels_3d=None,
    prob=0.5,
    max_rotate_degree=22.5,
    scaling_ratio_range=(0.95, 1.05),
    training=True,
    rng=None,
):
    """Host-side wrapper mirroring BEVRandomRotateScale.forward (feat path)."""
    # TODO(synk): gt_bboxes_3d.scale/rotate + in_range_bev filtering operate on
    # mmdet3d box objects with data-dependent sizes; no clean Pallas equivalent.
    rng = rng if rng is not None else random.Random(0)
    p = rng.uniform(0.0, 1.0)
    if p > prob or not training:
        return feat
    rotation_degree = rng.uniform(-max_rotate_degree, max_rotate_degree)
    scaling_ratio = rng.uniform(scaling_ratio_range[0], scaling_ratio_range[1])
    return bev_warp_pallas(feat, rotation_degree, scaling_ratio)


def _grid_sample_ref(feat, rotation_degree, scaling_ratio):
    """Pure-JAX f32 reference of the warped grid_sample (correctness check)."""
    B, C, H, W = feat.shape
    warp = _warp_matrix(rotation_degree, scaling_ratio)
    ii, jj = jnp.meshgrid(
        jnp.arange(H, dtype=jnp.float32),
        jnp.arange(W, dtype=jnp.float32),
        indexing="ij",
    )
    gx = 2.0 * (jj + 0.5) / W - 1.0
    gy = 2.0 * (ii + 0.5) / H - 1.0
    sx = warp[0, 0] * gx + warp[0, 1] * gy
    sy = warp[1, 0] * gx + warp[1, 1] * gy
    ix = ((sx + 1.0) * W - 1.0) * 0.5
    iy = ((sy + 1.0) * H - 1.0) * 0.5
    x0 = jnp.floor(ix).astype(jnp.int32)
    y0 = jnp.floor(iy).astype(jnp.int32)
    wx = ix - x0
    wy = iy - y0
    out = jnp.zeros_like(feat)
    for dy, dx, w in (
        (0, 0, (1 - wy) * (1 - wx)),
        (0, 1, (1 - wy) * wx),
        (1, 0, wy * (1 - wx)),
        (1, 1, wy * wx),
    ):
        xc = x0 + dx
        yc = y0 + dy
        valid = (xc >= 0) & (xc < W) & (yc >= 0) & (yc < H)
        xcc = jnp.clip(xc, 0, W - 1)
        ycc = jnp.clip(yc, 0, H - 1)
        vals = feat[:, :, ycc, xcc]
        out = out + vals * (w * valid)[None, None]
    return out


if __name__ == "__main__":
    key = jax.random.PRNGKey(0)
    k1, k2 = jax.random.split(key)

    # Primary config (small, module-consistent): B=2, C=4, H=W=16.
    B, C, H, W = 2, 4, 16, 16
    feat = jax.random.normal(k1, (B, C, H, W), dtype=jnp.float32)
    rotation_degree, scaling_ratio = 10.0, 1.02

    out = jax.block_until_ready(bev_warp_pallas(feat, rotation_degree, scaling_ratio))
    ref = _grid_sample_ref(feat, rotation_degree, scaling_ratio)
    assert out.shape == (B, C, H, W) and out.dtype == feat.dtype
    err = float(jnp.max(jnp.abs(out - ref)))
    assert err < 5e-2, f"mismatch vs reference: max abs err = {err}"

    # Secondary config exercising tiled/padded paths: non-power-of-two W,
    # padding on both the K and output-pixel axes, multiple output tiles,
    # larger BC kept fully resident (n_bc == 1).
    B2, C2, H2, W2 = 2, 96, 16, 20
    feat2 = jax.random.normal(k2, (B2, C2, H2, W2), dtype=jnp.float32)
    out2 = jax.block_until_ready(bev_warp_pallas(feat2, -17.0, 0.97))
    ref2 = _grid_sample_ref(feat2, -17.0, 0.97)
    err2 = float(jnp.max(jnp.abs(out2 - ref2)))
    assert err2 < 5e-2, f"mismatch vs reference (cfg2): max abs err = {err2}"

    # Force n_bc > 1 to exercise the bc == 0 M_T scratch-reuse gate.
    out3 = jax.block_until_ready(
        bev_warp_pallas(feat2, -17.0, 0.97, max_tile_bc=64))
    err3 = float(jnp.max(jnp.abs(out3 - ref2)))
    assert err3 < 5e-2, f"mismatch vs reference (cfg3): max abs err = {err3}"

    # Exercise the full forward-style wrapper (host-side probability gate).
    _ = jax.block_until_ready(
        bev_random_rotate_scale_forward(feat, rng=random.Random(1)))

    print("KERNEL_OK")
</pallas_src>

<mosaic_0001>
module attributes {stable_mosaic.version = 11 : i64} {
  func.func @_bev_grid_sample_kernel(%arg0: i32, %arg1: i32, %arg2: memref<1x128xf32, #tpu.memory_space<vmem>>, %arg3: memref<1x128xf32, #tpu.memory_space<vmem>>, %arg4: memref<16x256xbf16, #tpu.memory_space<vmem>>, %arg5: memref<16x128xf32, #tpu.memory_space<vmem>>, %arg6: memref<256x128xbf16, #tpu.memory_space<vmem>>) attributes {dimension_semantics = [#tpu.dimension_semantics<parallel>, #tpu.dimension_semantics<arbitrary>], iteration_bounds = array<i64: 2, 1>, scalar_prefetch = 0 : i64, scratch_operands = 1 : i64, tpu.core_type = #tpu.core_type<tc>, window_params = [{transform_indices = @transform_0, window_bounds = array<i64: 1, 128>}, {transform_indices = @transform_1, window_bounds = array<i64: 1, 128>}, {transform_indices = @transform_2, window_bounds = array<i64: 16, 256>}, {transform_indices = @transform_3, window_bounds = array<i64: 16, 128>}]} {
    %c0_i32 = arith.constant 0 : i32
    %0 = arith.cmpi eq, %arg1, %c0_i32 : i32
    %1 = arith.extui %0 : i1 to i32
    %c0_i32_0 = arith.constant 0 : i32
    %2 = arith.cmpi ne, %1, %c0_i32_0 : i32
    scf.if %2 {
      %c0_6 = arith.constant 0 : index
      %c0_7 = arith.constant 0 : index
      %7 = vector.load %arg2[%c0_6, %c0_7] : memref<1x128xf32, #tpu.memory_space<vmem>>, vector<1x128xf32>
      %c0_8 = arith.constant 0 : index
      %c0_9 = arith.constant 0 : index
      %8 = vector.load %arg3[%c0_8, %c0_9] : memref<1x128xf32, #tpu.memory_space<vmem>>, vector<1x128xf32>
      %cst_10 = arith.constant 1.000000e+00 : f32
      %9 = vector.broadcast %cst_10 : f32 to vector<1x128xf32>
      %10 = arith.addf %7, %9 : vector<1x128xf32>
      %cst_11 = arith.constant 1.600000e+01 : f32
      %11 = vector.broadcast %cst_11 : f32 to vector<1x128xf32>
      %12 = arith.mulf %10, %11 : vector<1x128xf32>
      %cst_12 = arith.constant 1.000000e+00 : f32
      %13 = vector.broadcast %cst_12 : f32 to vector<1x128xf32>
      %14 = arith.subf %12, %13 : vector<1x128xf32>
      %cst_13 = arith.constant 5.000000e-01 : f32
      %15 = vector.broadcast %cst_13 : f32 to vector<1x128xf32>
      %16 = arith.mulf %14, %15 : vector<1x128xf32>
      %cst_14 = arith.constant 1.000000e+00 : f32
      %17 = vector.broadcast %cst_14 : f32 to vector<1x128xf32>
      %18 = arith.addf %8, %17 : vector<1x128xf32>
      %cst_15 = arith.constant 1.600000e+01 : f32
      %19 = vector.broadcast %cst_15 : f32 to vector<1x128xf32>
      %20 = arith.mulf %18, %19 : vector<1x128xf32>
      %cst_16 = arith.constant 1.000000e+00 : f32
      %21 = vector.broadcast %cst_16 : f32 to vector<1x128xf32>
      %22 = arith.subf %20, %21 : vector<1x128xf32>
      %cst_17 = arith.constant 5.000000e-01 : f32
      %23 = vector.broadcast %cst_17 : f32 to vector<1x128xf32>
      %24 = arith.mulf %22, %23 : vector<1x128xf32>
      %25 = math.floor %16 : vector<1x128xf32>
      %26 = math.floor %24 : vector<1x128xf32>
      %27 = arith.subf %16, %25 : vector<1x128xf32>
      %28 = arith.subf %24, %26 : vector<1x128xf32>
      %29 = arith.fptosi %25 : vector<1x128xf32> to vector<1x128xi32>
      %30 = arith.fptosi %26 : vector<1x128xf32> to vector<1x128xi32>
      %cst_18 = arith.constant 1.000000e+00 : f32
      %31 = vector.broadcast %cst_18 : f32 to vector<1x128xf32>
      %32 = arith.subf %31, %28 : vector<1x128xf32>
      %cst_19 = arith.constant 1.000000e+00 : f32
      %33 = vector.broadcast %cst_19 : f32 to vector<1x128xf32>
      %34 = arith.subf %33, %27 : vector<1x128xf32>
      %35 = arith.mulf %32, %34 : vector<1x128xf32>
      %c0_i32_20 = arith.constant 0 : i32
      %36 = vector.broadcast %c0_i32_20 : i32 to vector<1x128xi32>
      %37 = arith.addi %29, %36 : vector<1x128xi32>
      %c0_i32_21 = arith.constant 0 : i32
      %38 = vector.broadcast %c0_i32_21 : i32 to vector<1x128xi32>
      %39 = arith.addi %30, %38 : vector<1x128xi32>
      %c0_i32_22 = arith.constant 0 : i32
      %40 = vector.broadcast %c0_i32_22 : i32 to vector<1x128xi32>
      %41 = arith.cmpi sge, %37, %40 : vector<1x128xi32>
      %c16_i32 = arith.constant 16 : i32
      %42 = vector.broadcast %c16_i32 : i32 to vector<1x128xi32>
      %43 = arith.cmpi slt, %37, %42 : vector<1x128xi32>
      %44 = arith.andi %41, %43 : vector<1x128xi1>
      %c0_i32_23 = arith.constant 0 : i32
      %45 = vector.broadcast %c0_i32_23 : i32 to vector<1x128xi32>
      %46 = arith.cmpi sge, %39, %45 : vector<1x128xi32>
      %47 = arith.andi %44, %46 : vector<1x128xi1>
      %c16_i32_24 = arith.constant 16 : i32
      %48 = vector.broadcast %c16_i32_24 : i32 to vector<1x128xi32>
      %49 = arith.cmpi slt, %39, %48 : vector<1x128xi32>
      %50 = arith.andi %47, %49 : vector<1x128xi1>
      %cst_25 = arith.constant 0.000000e+00 : f32
      %51 = vector.broadcast %cst_25 : f32 to vector<1x128xf32>
      %52 = arith.select %50, %35, %51 : vector<1x128xi1>, vector<1x128xf32>
      %cst_26 = arith.constant 1.000000e+00 : f32
      %53 = vector.broadcast %cst_26 : f32 to vector<1x128xf32>
      %54 = arith.subf %53, %28 : vector<1x128xf32>
      %55 = arith.mulf %54, %27 : vector<1x128xf32>
      %c1_i32 = arith.constant 1 : i32
      %56 = vector.broadcast %c1_i32 : i32 to vector<1x128xi32>
      %57 = arith.addi %29, %56 : vector<1x128xi32>
      %c0_i32_27 = arith.constant 0 : i32
      %58 = vector.broadcast %c0_i32_27 : i32 to vector<1x128xi32>
      %59 = arith.addi %30, %58 : vector<1x128xi32>
      %c0_i32_28 = arith.constant 0 : i32
      %60 = vector.broadcast %c0_i32_28 : i32 to vector<1x128xi32>
      %61 = arith.cmpi sge, %57, %60 : vector<1x128xi32>
      %c16_i32_29 = arith.constant 16 : i32
      %62 = vector.broadcast %c16_i32_29 : i32 to vector<1x128xi32>
      %63 = arith.cmpi slt, %57, %62 : vector<1x128xi32>
      %64 = arith.andi %61, %63 : vector<1x128xi1>
      %c0_i32_30 = arith.constant 0 : i32
      %65 = vector.broadcast %c0_i32_30 : i32 to vector<1x128xi32>
      %66 = arith.cmpi sge, %59, %65 : vector<1x128xi32>
      %67 = arith.andi %64, %66 : vector<1x128xi1>
      %c16_i32_31 = arith.constant 16 : i32
      %68 = vector.broadcast %c16_i32_31 : i32 to vector<1x128xi32>
      %69 = arith.cmpi slt, %59, %68 : vector<1x128xi32>
      %70 = arith.andi %67, %69 : vector<1x128xi1>
      %cst_32 = arith.constant 0.000000e+00 : f32
      %71 = vector.broadcast %cst_32 : f32 to vector<1x128xf32>
      %72 = arith.select %70, %55, %71 : vector<1x128xi1>, vector<1x128xf32>
      %cst_33 = arith.constant 1.000000e+00 : f32
      %73 = vector.broadcast %cst_33 : f32 to vector<1x128xf32>
      %74 = arith.subf %73, %27 : vector<1x128xf32>
      %75 = arith.mulf %28, %74 : vector<1x128xf32>
      %c0_i32_34 = arith.constant 0 : i32
      %76 = vector.broadcast %c0_i32_34 : i32 to vector<1x128xi32>
      %77 = arith.addi %29, %76 : vector<1x128xi32>
      %c1_i32_35 = arith.constant 1 : i32
      %78 = vector.broadcast %c1_i32_35 : i32 to vector<1x128xi32>
      %79 = arith.addi %30, %78 : vector<1x128xi32>
      %c0_i32_36 = arith.constant 0 : i32
      %80 = vector.broadcast %c0_i32_36 : i32 to vector<1x128xi32>
      %81 = arith.cmpi sge, %77, %80 : vector<1x128xi32>
      %c16_i32_37 = arith.constant 16 : i32
      %82 = vector.broadcast %c16_i32_37 : i32 to vector<1x128xi32>
      %83 = arith.cmpi slt, %77, %82 : vector<1x128xi32>
      %84 = arith.andi %81, %83 : vector<1x128xi1>
      %c0_i32_38 = arith.constant 0 : i32
      %85 = vector.broadcast %c0_i32_38 : i32 to vector<1x128xi32>
      %86 = arith.cmpi sge, %79, %85 : vector<1x128xi32>
      %87 = arith.andi %84, %86 : vector<1x128xi1>
      %c16_i32_39 = arith.constant 16 : i32
      %88 = vector.broadcast %c16_i32_39 : i32 to vector<1x128xi32>
      %89 = arith.cmpi slt, %79, %88 : vector<1x128xi32>
      %90 = arith.andi %87, %89 : vector<1x128xi1>
      %cst_40 = arith.constant 0.000000e+00 : f32
      %91 = vector.broadcast %cst_40 : f32 to vector<1x128xf32>
      %92 = arith.select %90, %75, %91 : vector<1x128xi1>, vector<1x128xf32>
      %93 = arith.mulf %28, %27 : vector<1x128xf32>
      %c1_i32_41 = arith.constant 1 : i32
      %94 = vector.broadcast %c1_i32_41 : i32 to vector<1x128xi32>
      %95 = arith.addi %29, %94 : vector<1x128xi32>
      %c1_i32_42 = arith.constant 1 : i32
      %96 = vector.broadcast %c1_i32_42 : i32 to vector<1x128xi32>
      %97 = arith.addi %30, %96 : vector<1x128xi32>
      %c0_i32_43 = arith.constant 0 : i32
      %98 = vector.broadcast %c0_i32_43 : i32 to vector<1x128xi32>
      %99 = arith.cmpi sge, %95, %98 : vector<1x128xi32>
      %c16_i32_44 = arith.constant 16 : i32
      %100 = vector.broadcast %c16_i32_44 : i32 to vector<1x128xi32>
      %101 = arith.cmpi slt, %95, %100 : vector<1x128xi32>
      %102 = arith.andi %99, %101 : vector<1x128xi1>
      %c0_i32_45 = arith.constant 0 : i32
      %103 = vector.broadcast %c0_i32_45 : i32 to vector<1x128xi32>
      %104 = arith.cmpi sge, %97, %103 : vector<1x128xi32>
      %105 = arith.andi %102, %104 : vector<1x128xi1>
      %c16_i32_46 = arith.constant 16 : i32
      %106 = vector.broadcast %c16_i32_46 : i32 to vector<1x128xi32>
      %107 = arith.cmpi slt, %97, %106 : vector<1x128xi32>
      %108 = arith.andi %105, %107 : vector<1x128xi1>
      %cst_47 = arith.constant 0.000000e+00 : f32
      %109 = vector.broadcast %cst_47 : f32 to vector<1x128xf32>
      %110 = arith.select %108, %93, %109 : vector<1x128xi1>, vector<1x128xf32>
      %111 = tpu.iota {dimensions = array<i32: 0>} : vector<256x128xi32>
      %c16_i32_48 = arith.constant 16 : i32
      %112 = vector.broadcast %c16_i32_48 : i32 to vector<1x128xi32>
      %113 = arith.muli %30, %112 : vector<1x128xi32>
      %114 = arith.addi %113, %29 : vector<1x128xi32>
      %115 = vector.broadcast %114 : vector<1x128xi32> to vector<256x128xi32>
      %116 = arith.subi %111, %115 : vector<256x128xi32>
      %c0_i32_49 = arith.constant 0 : i32
      %117 = vector.broadcast %c0_i32_49 : i32 to vector<256x128xi32>
      %118 = arith.cmpi eq, %116, %117 : vector<256x128xi32>
      %c1_i32_50 = arith.constant 1 : i32
      %119 = vector.broadcast %c1_i32_50 : i32 to vector<256x128xi32>
      %120 = arith.cmpi eq, %116, %119 : vector<256x128xi32>
      %c16_i32_51 = arith.constant 16 : i32
      %121 = vector.broadcast %c16_i32_51 : i32 to vector<256x128xi32>
      %122 = arith.cmpi eq, %116, %121 : vector<256x128xi32>
      %c17_i32 = arith.constant 17 : i32
      %123 = vector.broadcast %c17_i32 : i32 to vector<256x128xi32>
      %124 = arith.cmpi eq, %116, %123 : vector<256x128xi32>
      %cst_52 = arith.constant 0.000000e+00 : f32
      %125 = vector.shape_cast %110 : vector<1x128xf32> to vector<1x128xf32>
      %126 = vector.broadcast %125 : vector<1x128xf32> to vector<256x128xf32>
      %127 = vector.broadcast %cst_52 : f32 to vector<256x128xf32>
      %128 = arith.select %124, %126, %127 : vector<256x128xi1>, vector<256x128xf32>
      %129 = vector.shape_cast %92 : vector<1x128xf32> to vector<1x128xf32>
      %130 = vector.broadcast %129 : vector<1x128xf32> to vector<256x128xf32>
      %131 = arith.select %122, %130, %128 : vector<256x128xi1>, vector<256x128xf32>
      %132 = vector.shape_cast %72 : vector<1x128xf32> to vector<1x128xf32>
      %133 = vector.broadcast %132 : vector<1x128xf32> to vector<256x128xf32>
      %134 = arith.select %120, %133, %131 : vector<256x128xi1>, vector<256x128xf32>
      %135 = vector.shape_cast %52 : vector<1x128xf32> to vector<1x128xf32>
      %136 = vector.broadcast %135 : vector<1x128xf32> to vector<256x128xf32>
      %137 = arith.select %118, %136, %134 : vector<256x128xi1>, vector<256x128xf32>
      %138 = arith.truncf %137 : vector<256x128xf32> to vector<256x128xbf16>
      %c0_53 = arith.constant 0 : index
      %c0_54 = arith.constant 0 : index
      %139 = vector.load %arg6[%c0_53, %c0_54] : memref<256x128xbf16, #tpu.memory_space<vmem>>, vector<256x128xbf16>
      tpu.vector_store %arg6[%c0_53, %c0_54], %138 {strides = array<i32>} : memref<256x128xbf16, #tpu.memory_space<vmem>>, vector<256x128xbf16>,
    } else {
    }
    %c0 = arith.constant 0 : index
    %c0_1 = arith.constant 0 : index
    %3 = vector.load %arg4[%c0, %c0_1] : memref<16x256xbf16, #tpu.memory_space<vmem>>, vector<16x256xbf16>
    %c0_2 = arith.constant 0 : index
    %c0_3 = arith.constant 0 : index
    %4 = vector.load %arg6[%c0_2, %c0_3] : memref<256x128xbf16, #tpu.memory_space<vmem>>, vector<256x128xbf16>
    %cst = arith.constant dense<0.000000e+00> : vector<16x128xf32>
    %5 = tpu.matmul %3, %4, %cst {dimension_numbers = #tpu.dot_dimension_numbers<[1], [0], [0], [1], [0, 0, 1, 1], [], []>} : vector<16x256xbf16>, vector<256x128xbf16>, vector<16x128xf32> -> vector<16x128xf32>
    %c0_4 = arith.constant 0 : index
    %c0_5 = arith.constant 0 : index
    %6 = vector.load %arg5[%c0_4, %c0_5] : memref<16x128xf32, #tpu.memory_space<vmem>>, vector<16x128xf32>
    tpu.vector_store %arg5[%c0_4, %c0_5], %5 {strides = array<i32>} : memref<16x128xf32, #tpu.memory_space<vmem>>, vector<16x128xf32>,
    return
  }
  func.func @transform_0(%arg0: i32, %arg1: i32) -> (i32, i32) {
    %c0_i32 = arith.constant 0 : i32
    %c0_i32_0 = arith.constant 0 : i32
    return %c0_i32, %arg0 : i32, i32
  }
  func.func @transform_1(%arg0: i32, %arg1: i32) -> (i32, i32) {
    %c0_i32 = arith.constant 0 : i32
    %c0_i32_0 = arith.constant 0 : i32
    return %c0_i32, %arg0 : i32, i32
  }
  func.func @transform_2(%arg0: i32, %arg1: i32) -> (i32, i32) {
    %c0_i32 = arith.constant 0 : i32
    %c0_i32_0 = arith.constant 0 : i32
    return %arg1, %c0_i32 : i32, i32
  }
  func.func @transform_3(%arg0: i32, %arg1: i32) -> (i32, i32) {
    %c0_i32 = arith.constant 0 : i32
    return %arg1, %arg0 : i32, i32
  }
}

</mosaic_0001>

<bundles_post_ra>
// kernel: tpu_custom_call.1
= control target key start
LH: loop header
LB: loop body
LE: loop exit
PB: predicated region body
PF: predicated region fallthrough
CT: control target
= control target key end

     0   :  { %8 = vsyncpa [#allocation4], 0  ;;  %s1780_s0 = inlined_call_operand.hbm [shape: f32[1,256], index: 0, kind: input, shape index: {}]   ;;  %s1781_s1 = inlined_call_operand.vmem [shape: f32[1,256], index: 1, kind: input, shape index: {}]   ;;  %s1782_s2 = inlined_call_operand.hbm [shape: bf16[16,256], index: 2, kind: input, shape index: {}]   ;;  %s1783_s3 = inlined_call_operand.hbm [shape: f32[16,256], index: 3, kind: output, shape index: {}]  }
   0x1   :  { %10 = vsyncpa [#allocation4 + $0x1], 0 }
   0x2   :  { %11 = vsyncpa [#allocation7], 0 }
   0x3   :  { %12 = vsyncpa [#allocation5], 0 }
   0x4   :  { %14 = vsyncpa [#allocation5 + $0x1], 0  ;;  %s1157_s12 = smov 0   ;;  %s1159_s13 = smov 0  }
   0x5   :  { %s1161_s14 = smov 0   ;;  %s1163_s15 = smov 0  }
   0x6   :  { %s1165_s16 = smov 0   ;;  %s1167_s17 = smov 0  }
   0x7 LB: > { %s859_s18 = sadd.s32 4294967295, %s1127_s17   ;;  %s860_s19 = sadd.s32 4294967294, %s1127_s17   ;;  %s1127_s17 = sphi %s1167_s17, %s20_s17   ;;  %s1123_s16 = sphi %s1165_s16, %s1812_s16   ;;  %s1119_s15 = sphi %s1163_s15, %s1811_s15   ;;  %s1115_s14 = sphi %s1161_s14, %s1810_s14   ;;  %s1111_s13 = sphi %s1159_s13, %s1809_s13   ;;  %s1107_s12 = sphi %s1157_s12, %s1808_s12  }
   0x8   : > { %p52_p0 = scmp.ne.s32.totalorder %s1111_s13, %s1107_s12  ;;  %p1191_p1 = scmp.eq.s32.totalorder %s859_s18, 0 }
   0x9   : > { %p1195_p2 = scmp.eq.s32.totalorder %s859_s18, 1  ;;  %p136_p3 = scmp.eq.s32.totalorder %s860_s19, 1 }
   0xa   : > { %s1788_s20 = scalar_select %p1191_p1, 1, 0 }
   0xb   : > { %s1789_s21 = scalar_select %p1195_p2, 1, 0 }
   0xc   : > { %p1201_p4 = por %p1191_p1, %p52_p0  ;;  %p861_p5 = scmp.ge.s32.totalorder %s1127_s17, 1 }
   0xd   : > { %p1206_p6 = por %p136_p3, %p52_p0  ;;  %p143_p7 = scmp.lt.s32.totalorder %s1127_s17, 3 }
   0xe   : > { %s1790_s22 = scalar_select %p1201_p4, 1, 0 }
   0xf   : > { %s1791_s23 = scalar_select %p1206_p6, 1, 0 }
  0x10   : > { %p1211_p8 = pnand %p861_p5, %p143_p7  ;;  %s1129_s25 = smov [#allocation6]  }
  0x11   : > { %s159_s26 = sshll.u32 %s1129_s25, 4  ;;  %s32_s28 = sadd.s32 1, %s1123_s16  ;;  %s160_s26 = int_to_ptr.vmem [resolvable:$true] %s159_s26 }
  0x12   : > { %s1792_s24 = scalar_select %p1211_p8, 1, 0 }
  0x13   : > { %p910_p9 = pneg %p1211_p8  ;;  %s983_s4 = scalar_lea.hbm %s1782_s2, 256 }
  0x14   : > { %p984_p12 = scmp.ne.s32.totalorder %s1782_s2, %s983_s4  ;;  %p990_p5 = scmp.lt.u32.totalorder %s983_s4, %s1782_s2 }
  0x15   : > { %p1220_p11 = pnand %p910_p9, %p1191_p1 }
  0x17   : > { %p985_p13 = pneg %p1220_p11 }
  0x19   : > { %p986_p0 = pnand %p985_p13, %p984_p12 }
  0x1b   : > { %p987_p3 = pneg %p986_p0 }
  0x1d   : > { %p992_p7 = pnand %p990_p5, %p987_p3 }
  0x1f   : > { %995 = shalt.err (!%p992_p7)
}
  0x20   : > { %s996_s9 = scalar_lea.vmem %s160_s26, 256  ;;  %p1004_p1 = scmp.lt.s32.totalorder %s160_s26, %s160_s26 }
  0x21   : > { %p997_p9 = scmp.ne.s32.totalorder %s160_s26, %s996_s9  ;;  %p1005_p4 = scmp.lt.s32.totalorder %s996_s9, %s996_s9 }
  0x23   : > { %p999_p10 = pnand %p997_p9, %p985_p13  ;;  %p1006_p8 = por %p1005_p4, %p1004_p1 }
  0x25   : > { %p1000_p6 = pneg %p999_p10 }
  0x27   : > { %p1007_p2 = pnand %p1006_p8, %p1000_p6 }
  0x29   : > { %1010 = shalt.err (!%p1007_p2)
}
  0x2a   : > { %s1130_s10 = smov 128   ;;  %s1131_s11 = smov 8  }
  0x2b   : > { %913 = dma.hbm_to_vmem [thread:$0]  (!%p1220_p11), %s1782_s2, 256, %s160_s26, [#allocation7], %s1130_s10, %s1130_s10, %s1131_s11  }
  0x2c   : > { %p34_p1 = scmp.ge.s32.totalorder %s32_s28, 2  ;;  %p46_p2 = scmp.ne.s32.totalorder %s1115_s14, %s1111_s13 }
  0x2d   : > { %p47_p4 = scmp.eq.s32.totalorder %s1127_s17, 0  ;;  %s39_s25 = sadd.s32 1, %s1115_s14 }
  0x2e   : > { %s1814_s28 = smov (%p34_p1, %s32_s28), 0  ;;  %p1794_p6 = scmp.ne.s32.totalorder %s1789_s21, 0 }
  0x2f   : > { %s36_s30 = ssub.s32 %s1123_s16, %s1814_s28  ;;  %p48_p10 = por %p47_p4, %p46_p2 }
  0x30   : > { %p1249_p8 = por %p1794_p6, %p46_p2  ;;  %p37_p12 = scmp.eq.s32.totalorder %s36_s30, 0 }
  0x31   : > { %s173_s27 = sand.u32 1, %s1115_s14   ;;  %p923_p13 = scmp.lt.s32.totalorder %s1127_s17, 2 }
  0x32   : > { %s1258_s4 = scalar_select %p37_p12, %s1115_s14, %s39_s25  }
  0x33   : > { %s864_s26 = sshll.u32 %s1123_s16, 4  ;;  %s176_s5 = scalar_lea.vmem [#allocation3], %s173_s27 }
  0x34   : > { %s183_s6 = sshll.u32 %s176_s5, 4  ;;  %s1264_s9 = scalar_lea.hbm %s1780_s0, %s864_s26  ;;  %s1266_s6 = int_to_ptr.vmem [resolvable:$true] %s183_s6 }
  0x35   : > { %p1268_p11 = pnand %p923_p13, %p48_p10  ;;  %s174_s10 = scalar_lea.sflag [#allocation4], %s173_s27 }
  0x36   : > { %s1011_s11 = scalar_lea.hbm %s1264_s9, 16  ;;  %s1016_s25 = scalar_lea.hbm %s1780_s0, 32 }
  0x37   : > { %p1012_p0 = scmp.ne.s32.totalorder %s1264_s9, %s1011_s11  ;;  %p1013_p3 = pneg %p1268_p11 }
  0x38   : > { %p1017_p9 = scmp.lt.u32.totalorder %s1264_s9, %s1780_s0  ;;  %p1018_p1 = scmp.lt.u32.totalorder %s1016_s25, %s1011_s11 }
  0x39   : > { %p1014_p5 = pnand %p1013_p3, %p1012_p0  ;;  %p1020_p4 = scmp.lt.u32.totalorder %s1011_s11, %s1264_s9 }
  0x3a   : > { %p1019_p2 = por %p1018_p1, %p1017_p9 }
  0x3b   : > { %p1015_p7 = pneg %p1014_p5 }
  0x3c   : > { %p1021_p6 = por %p1020_p4, %p1019_p2 }
  0x3e   : > { %p1022_p10 = pnand %p1021_p6, %p1015_p7 }
  0x40   : > { %1025 = shalt.err (!%p1022_p10)
}
  0x41   : > { %s1026_s27 = scalar_lea.vmem %s1266_s6, 16  ;;  %s1132_s5 = smov [#allocation3]  }
  0x42   : > { %p1027_p12 = scmp.ne.s32.totalorder %s1266_s6, %s1026_s27  ;;  %s1031_s7 = sshll.u32 %s1132_s5, 4  ;;  %s1032_s7 = int_to_ptr.vmem [resolvable:$false] %s1031_s7 }
  0x43   : > { %s1033_s8 = scalar_lea.vmem %s1032_s7, 32  ;;  %p1034_p5 = scmp.lt.s32.totalorder %s1266_s6, %s1032_s7 }
  0x44   : > { %p1029_p13 = pnand %p1027_p12, %p1013_p3  ;;  %p1035_p9 = scmp.lt.s32.totalorder %s1033_s8, %s1026_s27 }
  0x46   : > { %p1030_p0 = pneg %p1029_p13  ;;  %p1036_p1 = por %p1035_p9, %p1034_p5 }
  0x48   : > { %p1037_p2 = pnand %p1036_p1, %p1030_p0 }
  0x4a   : > { %1040 = shalt.err (!%p1037_p2)
}
  0x4b   : > { %917 = dma.hbm_to_vmem [thread:$0]  (!%p1268_p11), %s1264_s9, 16, %s1266_s6, %s174_s10  }
  0x4c   : > { %p1797_p7 = scmp.ne.s32.totalorder %s1792_s24, 0 }
  0x4d   : > { %s1300_s11 = sand.u32 (!%p1797_p7), 1, %s1111_s13   ;;  %p1798_p3 = scmp.ne.s32.totalorder (!%p1797_p7), %s1790_s22, 0 }
  0x4e   : > { %198 = sbr.rel (%p1797_p7) target bundleno = 433 (0x1b1), region = 32  ;;  %s201_s18 = scalar_lea.sflag (!%p1797_p7), [#allocation4], %s1300_s11 }
  0x4f   : > { %s203_s19 = scalar_lea.vmem (!%p1797_p7), [#allocation3], %s1300_s11 }
  0x55   : > { %1094 = dma.done.wait (%p1798_p3), %s201_s18, 16  }
  0x56   : > { %1096 = vsyncadd (%p1798_p3), %s201_s18, 4294967280  ;;  %p1799_p4 = scmp.ne.s32.totalorder %s1788_s20, 0 }
  0x58   : > { %1098 = dma.done.wait (%p1799_p4), [#allocation7], 256  }
  0x59   : > { %1100 = vsyncadd (%p1799_p4), [#allocation7], 4294967040  ;;  %p232_p11 = scmp.lt.s32.totalorder %s1119_s15, 1  ;;  %v288_v0 = vlaneseq  ;;  %v242_v1 = vld [vmem:[%s203_s19] sm:$0x1]  ;;  %s867_s20 = sshll.u32 %s1300_s11, 4 }
  0x5a   : > { %v244_v3 = vadd.f32 1.0, %v242_v1  ;;  %v982_v8 = vld [vmem:[#allocation6 + $0x4] ss:$8 sps:$4 sm:$0xff]   ;;  %s231_s22 = scalar_lea.vmem [#allocation8], %s867_s20  ;;  %s873_s25 = sshll.u32 %s1119_s15, 7 }
  0x5b   : > { %s233_s24 = scalar_select %p232_p11, %s1119_s15, 1  ;;  %v1317_v7 = vshrl.u32 %v288_v0, 7  ;;  %731 = vmatprep.mubr.bf16.mxu0 %v982_v8 }
  0x5c   : > { %v245_v5 = vmul.f32 16.0, %v244_v3  ;;  %s758_s10 = sshll.u32 %s231_s22, 4  ;;  %s1731_s27 = scalar_lea.hbm %s1783_s3, %s873_s25  ;;  %s1726_s10 = int_to_ptr.vmem [resolvable:$true] %s758_s10 }
  0x5d   : > { %s234_s21 = scalar_lea.vmem %s1781_s1, %s233_s24  ;;  %v1320_v13 = vsub.s32 0, %v1317_v7  ;;  %v1323_v14 = vadd.s32 128, %v1317_v7  ;;  %v1326_v15 = vadd.s32 136, %v1317_v7  ;;  %v1329_v16 = vadd.s32 8, %v1317_v7  ;;  %s743_s5 = scalar_lea.sflag [#allocation5], %s1300_s11 }
  0x5e   : > { %v243_v2 = vld [vmem:[%s234_s21] sm:$0x1]  ;;  %v868_v9 = vadd.f32 -1.0, %v245_v5  ;;  %v1332_v17 = vadd.s32 144, %v1317_v7  ;;  %v1335_v20 = vadd.s32 152, %v1317_v7  ;;  %v1338_v21 = vadd.s32 16, %v1317_v7 }
  0x5f   : > { %v248_v4 = vadd.f32 1.0, %v243_v2  ;;  %v1341_v22 = vadd.s32 24, %v1317_v7  ;;  %v1344_v23 = vadd.s32 160, %v1317_v7  ;;  %v1347_v24 = vadd.s32 168, %v1317_v7  ;;  %s1041_s7 = scalar_lea.vmem %s1726_s10, 256  ;;  %s1133_s15 = smov [#allocation8]  }
  0x60   : > { %v247_v11 = vmul.f32 0.5, %v868_v9  ;;  %v1350_v25 = vadd.s32 32, %v1317_v7  ;;  %v1353_v30 = vadd.s32 40, %v1317_v7  ;;  %v1356_v31 = vadd.s32 176, %v1317_v7  ;;  %p1042_p6 = scmp.ne.s32.totalorder %s1726_s10, %s1041_s7  ;;  %s1045_s8 = sshll.u32 %s1133_s15, 4  ;;  %s1046_s8 = int_to_ptr.vmem [resolvable:$false] %s1045_s8 }
  0x61   : > { %v249_v6 = vmul.f32 16.0, %v248_v4  ;;  %v1359_v32 = vadd.s32 184, %v1317_v7  ;;  %v1362_v33 = vadd.s32 48, %v1317_v7  ;;  %v1365_v38 = vadd.s32 56, %v1317_v7  ;;  %s1047_s18 = scalar_lea.vmem %s1046_s8, 512  ;;  %p1048_p13 = scmp.lt.s32.totalorder %s1726_s10, %s1046_s8 }
  0x62   : > { %v252_v18 = vfloor.f32 %v247_v11  ;;  %v1368_v39 = vadd.s32 192, %v1317_v7  ;;  %v1371_v40 = vadd.s32 200, %v1317_v7  ;;  %v1374_v41 = vadd.s32 64, %v1317_v7  ;;  %p1043_p10 = pnand %p1042_p6, %p1249_p8  ;;  %p1049_p0 = scmp.lt.s32.totalorder %s1047_s18, %s1041_s7 }
  0x63   : > { %v869_v10 = vadd.f32 -1.0, %v249_v6  ;;  %v1381_v45 = vadd.s32 72, %v1317_v7  ;;  %v1384_v46 = vadd.s32 208, %v1317_v7  ;;  %v1390_v49 = vadd.s32 216, %v1317_v7 }
  0x64   : > { %v254_v26 = vsub.f32 %v247_v11, %v252_v18  ;;  %v898_v28 = vtrunc.f32 %v252_v18  ;;  %v1393_v50 = vadd.s32 80, %v1317_v7  ;;  %v1401_v53 = vadd.s32 88, %v1317_v7  ;;  %p1044_p12 = pneg %p1043_p10  ;;  %p1050_p5 = por %p1049_p0, %p1048_p13 }
  0x65   : > { %v251_v12 = vmul.f32 0.5, %v869_v10  ;;  %v1410_v57 = vadd.s32 224, %v1317_v7  ;;  %v1416_v59 = vadd.s32 232, %v1317_v7  ;;  %v1419_v60 = vadd.s32 96, %v1317_v7 }
  0x66   : > { %v899_v34 = vcvt.f32.s32 %v898_v28  ;;  %v259_v37 = vsub.f32 1.0, %v254_v26  ;;  %v1426_v62 = vadd.s32 104, %v1317_v7  ;;  %v1429_v63 = vadd.s32 240, %v1317_v7  ;;  %p1051_p9 = pnand %p1050_p5, %p1044_p12 }
  0x67   : > { %v253_v19 = vfloor.f32 %v251_v12  ;;  %v1432_v0 = vadd.s32 248, %v1317_v7  ;;  %v1441_v4 = vadd.s32 112, %v1317_v7 }
  0x68   : > { %vm261_vm0 = vcmp.ge.s32.totalorder %v899_v34, 0  ;;  %vm262_vm1 = vcmp.lt.s32.totalorder %v899_v34, 16  ;;  %v270_v44 = vadd.s32 1, %v899_v34 }
  0x69   : > { %v255_v27 = vsub.f32 %v251_v12, %v253_v19  ;;  %v900_v29 = vtrunc.f32 %v253_v19  ;;  %vm1376_vm3 = vmand %vm261_vm0, %vm262_vm1 }
  0x6a   : > { %vm271_vm7 = vcmp.ge.s32.totalorder %v270_v44, 0  ;;  %vm272_vm8 = vcmp.lt.s32.totalorder %v270_v44, 16 }
  0x6b   : > { %v901_v35 = vcvt.f32.s32 %v900_v29  ;;  %v258_v36 = vsub.f32 1.0, %v255_v27  ;;  %vm1405_vm9 = vmand %vm271_vm7, %vm272_vm8  ;;  %v277_v58 = vmul.f32 %v259_v37, %v255_v27  ;;  %v284_v2 = vmul.f32 %v255_v27, %v254_v26 }
  0x6d   : > { %v260_v42 = vmul.f32 %v259_v37, %v258_v36  ;;  %vm264_vm2 = vcmp.ge.s32.totalorder %v901_v35, 0  ;;  %vm266_vm4 = vcmp.lt.s32.totalorder %v901_v35, 16  ;;  %v278_v47 = vadd.s32 1, %v901_v35 }
  0x6e   : > { %vm265_vm5 = vmand %vm1376_vm3, %vm264_vm2  ;;  %v321_v48 = vmul.u32 16, %v901_v35  ;;  %v269_v52 = vmul.f32 %v258_v36, %v254_v26 }
  0x6f   : > { %vm1396_vm6 = vmand %vm265_vm5, %vm266_vm4  ;;  %vm279_vm10 = vcmp.ge.s32.totalorder %v278_v47, 0  ;;  %vm281_vm12 = vcmp.lt.s32.totalorder %v278_v47, 16 }
  0x70   : > { %v268_v54 = vsel %vm1396_vm6, %v260_v42, 0.0  ;;  %v322_v56 = vadd.s32 %v899_v34, %v321_v48  ;;  %vm274_vm11 = vmand %vm1405_vm9, %vm264_vm2 }
  0x71   : > { %vm275_vm13 = vmand %vm274_vm11, %vm266_vm4  ;;  %v1438_v3 = vrot.slane %v268_v54, %v1320_v13 }
  0x72   : > { %v1423_v61 = vrot.slane %v322_v56, %v1320_v13  ;;  %v276_v1 = vsel %vm275_vm13, %v269_v52, 0.0  ;;  %vm280_vm14 = vmand %vm1376_vm3, %vm279_vm10 }
  0x73   : > { %vm282_vm15 = vmand %vm280_vm14, %vm281_vm12  ;;  %v1445_v5 = vrot.slane %v276_v1, %v1320_v13 }
  0x74   : > { %v343_v6 = vsub.s32 %v1323_v14, %v1423_v61  ;;  %v344_v8 = vsub.s32 %v1326_v15, %v1423_v61  ;;  %v327_v9 = vsub.s32 %v1317_v7, %v1423_v61  ;;  %v283_v10 = vsel %vm282_vm15, %v277_v58, 0.0  ;;  %vm285_vm0 = vmand %vm1405_vm9, %vm279_vm10 }
  0x75   : > { %v328_v11 = vsub.s32 %v1329_v16, %v1423_v61  ;;  %v1460_v12 = vsub.s32 %v1332_v17, %v1423_v61  ;;  %v1464_v14 = vsub.s32 %v1335_v20, %v1423_v61  ;;  %vm286_vm1 = vmand %vm285_vm0, %vm281_vm12  ;;  %v1468_v15 = vrot.slane %v283_v10, %v1320_v13 }
  0x76   : > { %vm375_vm2 = vcmp.eq.s32.totalorder %v343_v6, 0  ;;  %vm376_vm3 = vcmp.eq.s32.totalorder %v344_v8, 0  ;;  %vm407_vm4 = vcmp.eq.s32.totalorder %v343_v6, 1  ;;  %v287_v18 = vsel %vm286_vm1, %v284_v2, 0.0 }
  0x77   : > { %vm408_vm5 = vcmp.eq.s32.totalorder %v344_v8, 1  ;;  %vm439_vm6 = vcmp.eq.s32.totalorder %v343_v6, 16  ;;  %vm440_vm7 = vcmp.eq.s32.totalorder %v344_v8, 16  ;;  %v1471_v16 = vrot.slane %v287_v18, %v1320_v13 }
  0x78   : > { %vm471_vm8 = vcmp.eq.s32.totalorder %v343_v6, 17  ;;  %vm472_vm9 = vcmp.eq.s32.totalorder %v344_v8, 17  ;;  %vm359_vm10 = vcmp.eq.s32.totalorder %v327_v9, 0  ;;  %vm360_vm11 = vcmp.eq.s32.totalorder %v328_v11, 0 }
  0x79   : > { %vm391_vm13 = vcmp.eq.s32.totalorder %v327_v9, 1  ;;  %vm392_vm14 = vcmp.eq.s32.totalorder %v328_v11, 1  ;;  %vm423_vm12 = vcmp.eq.s32.totalorder %v327_v9, 16  ;;  %v509_v17 = vsel %vm471_vm8, %v1471_v16, 0.0 }
  0x7a   : > { %v510_v19 = vsel %vm472_vm9, %v1471_v16, 0.0  ;;  %vm424_vm15 = vcmp.eq.s32.totalorder %v328_v11, 16  ;;  %vm455_vm0 = vcmp.eq.s32.totalorder %v327_v9, 17  ;;  %v547_v20 = vsel %vm439_vm6, %v1468_v15, %v509_v17 }
  0x7b   : > { %v548_v26 = vsel %vm440_vm7, %v1468_v15, %v510_v19  ;;  %vm456_vm1 = vcmp.eq.s32.totalorder %v328_v11, 17  ;;  %v493_v13 = vsel %vm455_vm0, %v1471_v16, 0.0  ;;  %v585_v27 = vsel %vm407_vm4, %v1445_v5, %v547_v20 }
  0x7c   : > { %v586_v28 = vsel %vm408_vm5, %v1445_v5, %v548_v26  ;;  %v494_v29 = vsel %vm456_vm1, %v1471_v16, 0.0  ;;  %v531_v34 = vsel %vm423_vm12, %v1468_v15, %v493_v13  ;;  %v623_v35 = vsel %vm375_vm2, %v1438_v3, %v585_v27 }
  0x7d   : > { %v624_v36 = vsel %vm376_vm3, %v1438_v3, %v586_v28  ;;  %v532_v37 = vsel %vm424_vm15, %v1468_v15, %v494_v29  ;;  %v569_v42 = vsel %vm391_vm13, %v1445_v5, %v531_v34  ;;  %vm377_vm4 = vcmp.eq.s32.totalorder %v1460_v12, 0 }
  0x7e   : > { %v647_v43 = vpack.c.bf16 %v624_v36, %v623_v35  ;;  %v570_v44 = vsel %vm392_vm14, %v1445_v5, %v532_v37  ;;  %v607_v47 = vsel %vm359_vm10, %v1438_v3, %v569_v42  ;;  %vm378_vm2 = vcmp.eq.s32.totalorder %v1464_v14, 0 }
  0x7f   : > { %v608_v48 = vsel %vm360_vm11, %v1438_v3, %v570_v44  ;;  %vm409_vm3 = vcmp.eq.s32.totalorder %v1460_v12, 1  ;;  %vm410_vm5 = vcmp.eq.s32.totalorder %v1464_v14, 1  ;;  %vm441_vm6 = vcmp.eq.s32.totalorder %v1460_v12, 16 }
  0x80   : > { %876 = vmatprep.subr.bf16.mxu0 %v647_v43  ;;  %v639_v51 = vpack.c.bf16 %v608_v48, %v607_v47  ;;  %vm442_vm7 = vcmp.eq.s32.totalorder %v1464_v14, 16  ;;  %vm473_vm8 = vcmp.eq.s32.totalorder %v1460_v12, 17  ;;  %vm474_vm9 = vcmp.eq.s32.totalorder %v1464_v14, 17 }
  0x81   : > { %v511_v52 = vsel %vm473_vm8, %v1471_v16, 0.0  ;;  %v329_v54 = vsub.s32 %v1338_v21, %v1423_v61  ;;  %v330_v55 = vsub.s32 %v1341_v22, %v1423_v61  ;;  %v512_v56 = vsel %vm474_vm9, %v1471_v16, 0.0 }
  0x82   : > { %877 = vmatpush3.bf16.msra.mxu0 %v639_v51  ;;  %v549_v58 = vsel %vm441_vm6, %v1468_v15, %v511_v52  ;;  %v347_v1 = vsub.s32 %v1344_v23, %v1423_v61  ;;  %v348_v2 = vsub.s32 %v1347_v24, %v1423_v61  ;;  %v550_v6 = vsel %vm442_vm7, %v1468_v15, %v512_v56 }
  0x83   : > { %v587_v21 = vsel %vm409_vm3, %v1445_v5, %v549_v58  ;;  %vm361_vm10 = vcmp.eq.s32.totalorder %v329_v54, 0  ;;  %vm362_vm11 = vcmp.eq.s32.totalorder %v330_v55, 0  ;;  %v588_v22 = vsel %vm410_vm5, %v1445_v5, %v550_v6 }
  0x84   : > { %v625_v8 = vsel %vm377_vm4, %v1438_v3, %v587_v21  ;;  %vm393_vm13 = vcmp.eq.s32.totalorder %v329_v54, 1  ;;  %vm394_vm14 = vcmp.eq.s32.totalorder %v330_v55, 1  ;;  %v626_v23 = vsel %vm378_vm2, %v1438_v3, %v588_v22 }
  0x85   : > { %vm425_vm12 = vcmp.eq.s32.totalorder %v329_v54, 16  ;;  %vm426_vm15 = vcmp.eq.s32.totalorder %v330_v55, 16  ;;  %vm457_vm0 = vcmp.eq.s32.totalorder %v329_v54, 17  ;;  %v648_v24 = vpack.c.bf16 %v626_v23, %v625_v8 }
  0x86   : > { %vm458_vm1 = vcmp.eq.s32.totalorder %v330_v55, 17  ;;  %v495_v9 = vsel %vm457_vm0, %v1471_v16, 0.0  ;;  %vm379_vm3 = vcmp.eq.s32.totalorder %v347_v1, 0  ;;  %vm380_vm5 = vcmp.eq.s32.totalorder %v348_v2, 0 }
  0x87   : > { %v496_v10 = vsel %vm458_vm1, %v1471_v16, 0.0  ;;  %v533_v11 = vsel %vm425_vm12, %v1468_v15, %v495_v9  ;;  %vm411_vm4 = vcmp.eq.s32.totalorder %v347_v1, 1  ;;  %878 = vmatprep.subr.bf16.mxu0 %v648_v24  ;;  %vm412_vm2 = vcmp.eq.s32.totalorder %v348_v2, 1 }
  0x88   : > { %v534_v12 = vsel %vm426_vm15, %v1468_v15, %v496_v10  ;;  %v571_v14 = vsel %vm393_vm13, %v1445_v5, %v533_v11  ;;  %vm443_vm6 = vcmp.eq.s32.totalorder %v347_v1, 16  ;;  %vm444_vm7 = vcmp.eq.s32.totalorder %v348_v2, 16 }
  0x89   : > { %v572_v18 = vsel %vm394_vm14, %v1445_v5, %v534_v12  ;;  %v609_v17 = vsel %vm361_vm10, %v1438_v3, %v571_v14  ;;  %vm475_vm8 = vcmp.eq.s32.totalorder %v347_v1, 17  ;;  %vm476_vm9 = vcmp.eq.s32.totalorder %v348_v2, 17 }
  0x8a   : > { %v610_v19 = vsel %vm362_vm11, %v1438_v3, %v572_v18  ;;  %v513_v20 = vsel %vm475_vm8, %v1471_v16, 0.0  ;;  %v331_v26 = vsub.s32 %v1350_v25, %v1423_v61  ;;  %v514_v27 = vsel %vm476_vm9, %v1471_v16, 0.0 }
  0x8b   : > { %v640_v13 = vpack.c.bf16 %v610_v19, %v609_v17  ;;  %v551_v28 = vsel %vm443_vm6, %v1468_v15, %v513_v20  ;;  %v332_v29 = vsub.s32 %v1353_v30, %v1423_v61  ;;  %v552_v34 = vsel %vm444_vm7, %v1468_v15, %v514_v27 }
  0x8c   : > { %v589_v35 = vsel %vm411_vm4, %v1445_v5, %v551_v28  ;;  %vm363_vm10 = vcmp.eq.s32.totalorder %v331_v26, 0  ;;  %vm395_vm11 = vcmp.eq.s32.totalorder %v331_v26, 1  ;;  %v590_v36 = vsel %vm412_vm2, %v1445_v5, %v552_v34 }
  0x8d   : > { %879 = vmatpush3.bf16.msra.mxu0 %v640_v13  ;;  %v627_v25 = vsel %vm379_vm3, %v1438_v3, %v589_v35  ;;  %vm364_vm13 = vcmp.eq.s32.totalorder %v332_v29, 0  ;;  %vm396_vm14 = vcmp.eq.s32.totalorder %v332_v29, 1  ;;  %v628_v37 = vsel %vm380_vm5, %v1438_v3, %v590_v36 }
  0x8e   : > { %vm427_vm12 = vcmp.eq.s32.totalorder %v331_v26, 16  ;;  %vm428_vm15 = vcmp.eq.s32.totalorder %v332_v29, 16  ;;  %vm459_vm0 = vcmp.eq.s32.totalorder %v331_v26, 17  ;;  %v649_v30 = vpack.c.bf16 %v628_v37, %v627_v25 }
  0x8f   : > { %vm460_vm1 = vcmp.eq.s32.totalorder %v332_v29, 17  ;;  %v497_v42 = vsel %vm459_vm0, %v1471_v16, 0.0  ;;  %v349_v43 = vsub.s32 %v1356_v31, %v1423_v61  ;;  %v350_v48 = vsub.s32 %v1359_v32, %v1423_v61 }
  0x90   : > { %v498_v44 = vsel %vm460_vm1, %v1471_v16, 0.0  ;;  %v535_v47 = vsel %vm427_vm12, %v1468_v15, %v497_v42  ;;  %v333_v51 = vsub.s32 %v1362_v33, %v1423_v61  ;;  %880 = vmatprep.subr.bf16.mxu0 %v649_v30  ;;  %v334_v58 = vsub.s32 %v1365_v38, %v1423_v61 }
  0x91   : > { %v536_v52 = vsel %vm428_vm15, %v1468_v15, %v498_v44  ;;  %v573_v54 = vsel %vm395_vm11, %v1445_v5, %v535_v47  ;;  %vm381_vm3 = vcmp.eq.s32.totalorder %v349_v43, 0  ;;  %vm413_vm5 = vcmp.eq.s32.totalorder %v349_v43, 1 }
  0x92   : > { %v574_v31 = vsel %vm396_vm14, %v1445_v5, %v536_v52  ;;  %v611_v55 = vsel %vm363_vm10, %v1438_v3, %v573_v54  ;;  %vm382_vm4 = vcmp.eq.s32.totalorder %v350_v48, 0  ;;  %vm414_vm2 = vcmp.eq.s32.totalorder %v350_v48, 1 }
  0x93   : > { %v612_v32 = vsel %vm364_vm13, %v1438_v3, %v574_v31  ;;  %vm445_vm6 = vcmp.eq.s32.totalorder %v349_v43, 16  ;;  %vm446_vm7 = vcmp.eq.s32.totalorder %v350_v48, 16  ;;  %vm477_vm8 = vcmp.eq.s32.totalorder %v349_v43, 17 }
  0x94   : > { %v641_v33 = vpack.c.bf16 %v612_v32, %v611_v55  ;;  %vm478_vm9 = vcmp.eq.s32.totalorder %v350_v48, 17  ;;  %v515_v56 = vsel %vm477_vm8, %v1471_v16, 0.0  ;;  %vm365_vm10 = vcmp.eq.s32.totalorder %v333_v51, 0 }
  0x95   : > { %v516_v1 = vsel %vm478_vm9, %v1471_v16, 0.0  ;;  %v553_v2 = vsel %vm445_vm6, %v1468_v15, %v515_v56  ;;  %vm397_vm11 = vcmp.eq.s32.totalorder %v333_v51, 1  ;;  %vm366_vm13 = vcmp.eq.s32.totalorder %v334_v58, 0 }
  0x96   : > { %881 = vmatpush3.bf16.msra.mxu0 %v641_v33  ;;  %v554_v6 = vsel %vm446_vm7, %v1468_v15, %v516_v1  ;;  %v591_v21 = vsel %vm413_vm5, %v1445_v5, %v553_v2  ;;  %vm398_vm14 = vcmp.eq.s32.totalorder %v334_v58, 1  ;;  %vm429_vm12 = vcmp.eq.s32.totalorder %v333_v51, 16 }
  0x97   : > { %v592_v22 = vsel %vm414_vm2, %v1445_v5, %v554_v6  ;;  %v629_v38 = vsel %vm381_vm3, %v1438_v3, %v591_v21  ;;  %vm430_vm15 = vcmp.eq.s32.totalorder %v334_v58, 16  ;;  %vm461_vm0 = vcmp.eq.s32.totalorder %v333_v51, 17 }
  0x98   : > { %v630_v8 = vsel %vm382_vm4, %v1438_v3, %v592_v22  ;;  %vm462_vm1 = vcmp.eq.s32.totalorder %v334_v58, 17  ;;  %v351_v23 = vsub.s32 %v1368_v39, %v1423_v61  ;;  %v499_v9 = vsel %vm461_vm0, %v1471_v16, 0.0 }
  0x99   : > { %v650_v24 = vpack.c.bf16 %v630_v8, %v629_v38  ;;  %v500_v10 = vsel %vm462_vm1, %v1471_v16, 0.0  ;;  %v352_v11 = vsub.s32 %v1371_v40, %v1423_v61  ;;  %v537_v12 = vsel %vm429_vm12, %v1468_v15, %v499_v9 }
  0x9a   : > { %v538_v14 = vsel %vm430_vm15, %v1468_v15, %v500_v10  ;;  %vm383_vm3 = vcmp.eq.s32.totalorder %v351_v23, 0  ;;  %vm415_vm5 = vcmp.eq.s32.totalorder %v351_v23, 1  ;;  %v575_v18 = vsel %vm397_vm11, %v1445_v5, %v537_v12 }
  0x9b   : > { %882 = vmatprep.subr.bf16.mxu0 %v650_v24  ;;  %v576_v39 = vsel %vm398_vm14, %v1445_v5, %v538_v14  ;;  %vm384_vm4 = vcmp.eq.s32.totalorder %v352_v11, 0  ;;  %vm416_vm2 = vcmp.eq.s32.totalorder %v352_v11, 1  ;;  %v613_v17 = vsel %vm365_vm10, %v1438_v3, %v575_v18 }
  0x9c   : > { %v614_v40 = vsel %vm366_vm13, %v1438_v3, %v576_v39  ;;  %vm447_vm6 = vcmp.eq.s32.totalorder %v351_v23, 16  ;;  %vm448_vm7 = vcmp.eq.s32.totalorder %v352_v11, 16  ;;  %vm479_vm8 = vcmp.eq.s32.totalorder %v351_v23, 17 }
  0x9d   : > { %v642_v19 = vpack.c.bf16 %v614_v40, %v613_v17  ;;  %vm480_vm9 = vcmp.eq.s32.totalorder %v352_v11, 17  ;;  %v335_v20 = vsub.s32 %v1374_v41, %v1423_v61  ;;  %v517_v26 = vsel %vm479_vm8, %v1471_v16, 0.0 }
  0x9e   : > { %v518_v13 = vsel %vm480_vm9, %v1471_v16, 0.0  ;;  %v336_v27 = vsub.s32 %v1381_v45, %v1423_v61  ;;  %v353_v28 = vsub.s32 %v1384_v46, %v1423_v61  ;;  %v555_v29 = vsel %vm447_vm6, %v1468_v15, %v517_v26 }
  0x9f   : > { %883 = vmatpush3.bf16.msra.mxu0 %v642_v19  ;;  %v556_v34 = vsel %vm448_vm7, %v1468_v15, %v518_v13  ;;  %vm367_vm10 = vcmp.eq.s32.totalorder %v335_v20, 0  ;;  %vm399_vm11 = vcmp.eq.s32.totalorder %v335_v20, 1  ;;  %v593_v41 = vsel %vm415_vm5, %v1445_v5, %v555_v29 }
  0xa0   : > { %v594_v35 = vsel %vm416_vm2, %v1445_v5, %v556_v34  ;;  %vm368_vm13 = vcmp.eq.s32.totalorder %v336_v27, 0  ;;  %vm400_vm14 = vcmp.eq.s32.totalorder %v336_v27, 1  ;;  %v631_v45 = vsel %vm383_vm3, %v1438_v3, %v593_v41 }
  0xa1   : > { %v632_v46 = vsel %vm384_vm4, %v1438_v3, %v594_v35  ;;  %vm431_vm12 = vcmp.eq.s32.totalorder %v335_v20, 16  ;;  %vm432_vm15 = vcmp.eq.s32.totalorder %v336_v27, 16  ;;  %vm463_vm0 = vcmp.eq.s32.totalorder %v335_v20, 17 }
  0xa2   : > { %v651_v36 = vpack.c.bf16 %v632_v46, %v631_v45  ;;  %vm464_vm1 = vcmp.eq.s32.totalorder %v336_v27, 17  ;;  %v354_v25 = vsub.s32 %v1390_v49, %v1423_v61  ;;  %v501_v37 = vsel %vm463_vm0, %v1471_v16, 0.0 }
  0xa3   : > { %v502_v30 = vsel %vm464_vm1, %v1471_v16, 0.0  ;;  %vm385_vm5 = vcmp.eq.s32.totalorder %v353_v28, 0  ;;  %vm417_vm2 = vcmp.eq.s32.totalorder %v353_v28, 1  ;;  %v539_v42 = vsel %vm431_vm12, %v1468_v15, %v501_v37 }
  0xa4   : > { %884 = vmatprep.subr.bf16.mxu0 %v651_v36  ;;  %v540_v43 = vsel %vm432_vm15, %v1468_v15, %v502_v30  ;;  %vm386_vm3 = vcmp.eq.s32.totalorder %v354_v25, 0  ;;  %vm418_vm4 = vcmp.eq.s32.totalorder %v354_v25, 1  ;;  %v577_v44 = vsel %vm399_vm11, %v1445_v5, %v539_v42 }
  0xa5   : > { %v578_v47 = vsel %vm400_vm14, %v1445_v5, %v540_v43  ;;  %vm449_vm6 = vcmp.eq.s32.totalorder %v353_v28, 16  ;;  %vm450_vm7 = vcmp.eq.s32.totalorder %v354_v25, 16  ;;  %v615_v49 = vsel %vm367_vm10, %v1438_v3, %v577_v44 }
  0xa6   : > { %v616_v48 = vsel %vm368_vm13, %v1438_v3, %v578_v47  ;;  %vm481_vm8 = vcmp.eq.s32.totalorder %v353_v28, 17  ;;  %vm482_vm9 = vcmp.eq.s32.totalorder %v354_v25, 17  ;;  %v337_v31 = vsub.s32 %v1393_v50, %v1423_v61 }
  0xa7   : > { %v643_v51 = vpack.c.bf16 %v616_v48, %v615_v49  ;;  %v519_v52 = vsel %vm481_vm8, %v1471_v16, 0.0  ;;  %v520_v54 = vsel %vm482_vm9, %v1471_v16, 0.0  ;;  %v338_v33 = vsub.s32 %v1401_v53, %v1423_v61 }
  0xa8   : > { %v557_v55 = vsel %vm449_vm6, %v1468_v15, %v519_v52  ;;  %v558_v32 = vsel %vm450_vm7, %v1468_v15, %v520_v54  ;;  %v355_v56 = vsub.s32 %v1410_v57, %v1423_v61  ;;  %vm369_vm10 = vcmp.eq.s32.totalorder %v337_v31, 0 }
  0xa9   : > { %885 = vmatpush3.bf16.msra.mxu0 %v643_v51  ;;  %v595_v58 = vsel %vm417_vm2, %v1445_v5, %v557_v55  ;;  %v596_v1 = vsel %vm418_vm4, %v1445_v5, %v558_v32  ;;  %vm401_vm11 = vcmp.eq.s32.totalorder %v337_v31, 1  ;;  %vm370_vm13 = vcmp.eq.s32.totalorder %v338_v33, 0 }
  0xaa   : > { %v633_v50 = vsel %vm385_vm5, %v1438_v3, %v595_v58  ;;  %v634_v2 = vsel %vm386_vm3, %v1438_v3, %v596_v1  ;;  %vm402_vm14 = vcmp.eq.s32.totalorder %v338_v33, 1  ;;  %vm433_vm12 = vcmp.eq.s32.totalorder %v337_v31, 16 }
  0xab   : > { %v652_v53 = vpack.c.bf16 %v634_v2, %v633_v50  ;;  %vm434_vm15 = vcmp.eq.s32.totalorder %v338_v33, 16  ;;  %vm465_vm0 = vcmp.eq.s32.totalorder %v337_v31, 17  ;;  %vm466_vm1 = vcmp.eq.s32.totalorder %v338_v33, 17  ;;  %v980_v33 = vld [vmem:[#allocation6] ss:$8 sps:$4 sm:$0xff]  }
  0xac   : > { %v503_v57 = vsel %vm465_vm0, %v1471_v16, 0.0  ;;  %v356_v6 = vsub.s32 %v1416_v59, %v1423_v61  ;;  %vm387_vm2 = vcmp.eq.s32.totalorder %v355_v56, 0  ;;  %v504_v21 = vsel %vm466_vm1, %v1471_v16, 0.0 }
  0xad   : > { %886 = vmatprep.subr.bf16.mxu0 %v652_v53  ;;  %v541_v22 = vsel %vm433_vm12, %v1468_v15, %v503_v57  ;;  %vm419_vm5 = vcmp.eq.s32.totalorder %v355_v56, 1  ;;  %vm451_vm3 = vcmp.eq.s32.totalorder %v355_v56, 16  ;;  %v542_v38 = vsel %vm434_vm15, %v1468_v15, %v504_v21 }
  0xae   : > { %v579_v8 = vsel %vm401_vm11, %v1445_v5, %v541_v22  ;;  %vm388_vm4 = vcmp.eq.s32.totalorder %v356_v6, 0  ;;  %vm420_vm6 = vcmp.eq.s32.totalorder %v356_v6, 1  ;;  %v580_v23 = vsel %vm402_vm14, %v1445_v5, %v542_v38 }
  0xaf   : > { %v617_v59 = vsel %vm369_vm10, %v1438_v3, %v579_v8  ;;  %vm452_vm7 = vcmp.eq.s32.totalorder %v356_v6, 16  ;;  %vm483_vm8 = vcmp.eq.s32.totalorder %v355_v56, 17  ;;  %v618_v24 = vsel %vm370_vm13, %v1438_v3, %v580_v23 }
  0xb0   : > { %vm484_vm9 = vcmp.eq.s32.totalorder %v356_v6, 17  ;;  %v521_v9 = vsel %vm483_vm8, %v1471_v16, 0.0  ;;  %v339_v10 = vsub.s32 %v1419_v60, %v1423_v61  ;;  %v644_v11 = vpack.c.bf16 %v618_v24, %v617_v59 }
  0xb1   : > { %v522_v12 = vsel %vm484_vm9, %v1471_v16, 0.0  ;;  %v559_v14 = vsel %vm451_vm3, %v1468_v15, %v521_v9  ;;  %v340_v18 = vsub.s32 %v1426_v62, %v1423_v61  ;;  %v304_v40 = vadd.s32 120, %v1317_v7 }
  0xb2   : > { %v560_v39 = vsel %vm452_vm7, %v1468_v15, %v522_v12  ;;  %v597_v17 = vsel %vm419_vm5, %v1445_v5, %v559_v14  ;;  %vm371_vm10 = vcmp.eq.s32.totalorder %v339_v10, 0  ;;  %887 = vmatpush3.bf16.msra.mxu0 %v644_v11  ;;  %vm403_vm11 = vcmp.eq.s32.totalorder %v339_v10, 1 }
  0xb3   : > { %v598_v60 = vsel %vm420_vm6, %v1445_v5, %v560_v39  ;;  %v635_v19 = vsel %vm387_vm2, %v1438_v3, %v597_v17  ;;  %vm404_vm13 = vcmp.eq.s32.totalorder %v340_v18, 1  ;;  %vm435_vm14 = vcmp.eq.s32.totalorder %v339_v10, 16 }
  0xb4   : > { %v636_v62 = vsel %vm388_vm4, %v1438_v3, %v598_v60  ;;  %vm436_vm12 = vcmp.eq.s32.totalorder %v340_v18, 16  ;;  %vm467_vm15 = vcmp.eq.s32.totalorder %v339_v10, 17  ;;  %vm468_vm0 = vcmp.eq.s32.totalorder %v340_v18, 17 }
  0xb5   : > { %v653_v20 = vpack.c.bf16 %v636_v62, %v635_v19  ;;  %v505_v26 = vsel %vm467_vm15, %v1471_v16, 0.0  ;;  %v357_v7 = vsub.s32 %v1429_v63, %v1423_v61  ;;  %vm372_vm1 = vcmp.eq.s32.totalorder %v340_v18, 0 }
  0xb6   : > { %v506_v13 = vsel %vm468_vm0, %v1471_v16, 0.0  ;;  %v543_v27 = vsel %vm435_vm14, %v1468_v15, %v505_v26  ;;  %v358_v28 = vsub.s32 %v1432_v0, %v1423_v61  ;;  %v341_v41 = vsub.s32 %v1441_v4, %v1423_v61 }
  0xb7   : > { %888 = vmatprep.subr.bf16.mxu0 %v653_v20  ;;  %v544_v29 = vsel %vm436_vm12, %v1468_v15, %v506_v13  ;;  %v581_v34 = vsel %vm403_vm11, %v1445_v5, %v543_v27  ;;  %vm389_vm2 = vcmp.eq.s32.totalorder %v357_v7, 0  ;;  %vm421_vm5 = vcmp.eq.s32.totalorder %v357_v7, 1 }
  0xb8   : > { %v582_v63 = vsel %vm404_vm13, %v1445_v5, %v544_v29  ;;  %v619_v35 = vsel %vm371_vm10, %v1438_v3, %v581_v34  ;;  %vm422_vm3 = vcmp.eq.s32.totalorder %v358_v28, 1  ;;  %vm453_vm4 = vcmp.eq.s32.totalorder %v357_v7, 16 }
  0xb9   : > { %v620_v0 = vsel %vm372_vm1, %v1438_v3, %v582_v63  ;;  %vm454_vm6 = vcmp.eq.s32.totalorder %v358_v28, 16  ;;  %vm485_vm7 = vcmp.eq.s32.totalorder %v357_v7, 17  ;;  %vm486_vm8 = vcmp.eq.s32.totalorder %v358_v28, 17 }
  0xba   : > { %v645_v45 = vpack.c.bf16 %v620_v0, %v619_v35  ;;  %v523_v46 = vsel %vm485_vm7, %v1471_v16, 0.0  ;;  %v342_v36 = vsub.s32 %v304_v40, %v1423_v61  ;;  %vm390_vm9 = vcmp.eq.s32.totalorder %v358_v28, 0 }
  0xbb   : > { %v524_v4 = vsel %vm486_vm8, %v1471_v16, 0.0  ;;  %v561_v25 = vsel %vm453_vm4, %v1468_v15, %v523_v46  ;;  %vm373_vm10 = vcmp.eq.s32.totalorder %v341_v41, 0  ;;  %vm405_vm11 = vcmp.eq.s32.totalorder %v341_v41, 1 }
  0xbc   : > { %889 = vmatpush3.bf16.msra.mxu0 %v645_v45  ;;  %v562_v37 = vsel %vm454_vm6, %v1468_v15, %v524_v4  ;;  %v599_v30 = vsel %vm421_vm5, %v1445_v5, %v561_v25  ;;  %vm437_vm13 = vcmp.eq.s32.totalorder %v341_v41, 16  ;;  %vm438_vm14 = vcmp.eq.s32.totalorder %v342_v36, 16 }
  0xbd   : > { %v600_v42 = vsel %vm422_vm3, %v1445_v5, %v562_v37  ;;  %v637_v43 = vsel %vm389_vm2, %v1438_v3, %v599_v30  ;;  %vm406_vm12 = vcmp.eq.s32.totalorder %v342_v36, 1  ;;  %vm469_vm15 = vcmp.eq.s32.totalorder %v341_v41, 17 }
  0xbe   : > { %v638_v61 = vsel %vm390_vm9, %v1438_v3, %v600_v42  ;;  %vm470_vm0 = vcmp.eq.s32.totalorder %v342_v36, 17  ;;  %vm374_vm1 = vcmp.eq.s32.totalorder %v342_v36, 0  ;;  %v507_v47 = vsel %vm469_vm15, %v1471_v16, 0.0 }
  0xbf   : > { %v654_v44 = vpack.c.bf16 %v638_v61, %v637_v43  ;;  %v508_v49 = vsel %vm470_vm0, %v1471_v16, 0.0  ;;  %v545_v48 = vsel %vm437_vm13, %v1468_v15, %v507_v47 }
  0xc0   : > { %v546_v51 = vsel %vm438_vm14, %v1468_v15, %v508_v49  ;;  %v583_v52 = vsel %vm405_vm11, %v1445_v5, %v545_v48 }
  0xc1   : > { %890 = vmatprep.subr.bf16.mxu0 %v654_v44  ;;  %v584_v54 = vsel %vm406_vm12, %v1445_v5, %v546_v51  ;;  %v621_v31 = vsel %vm373_vm10, %v1438_v3, %v583_v52 }
  0xc2   : > { %v622_v55 = vsel %vm374_vm1, %v1438_v3, %v584_v54 }
  0xc3   : > { %v646_v32 = vpack.c.bf16 %v622_v55, %v621_v31 }
  0xc5   : > { %891 = vmatpush3.bf16.msra.mxu0 %v646_v32 }
  0xc8   : > { %732 = vmatmul.mubr.bf16.vlgmr.msra.gmra.mrb[0].mxu0 %v980_v33 }
 0x19b   : > { %v892_v15 = vpop.f32.mrb[0].mxu0 }
 0x19c   : > { %v893_v16 = vpop.f32.mrb[1].mxu0 }
 0x19d   : > { %v894_v56 = vadd.f32 %v893_v16, %v892_v15  ;;  %v895_v5 = vpop.f32.mrb[2].mxu0 }
 0x19e   : > { %v896_v3 = vpop.f32.mrb[3].mxu0 }
 0x19f   : > { %740 = vst [vmem:[%s231_s22] sm:$0xff] %v894_v56  ;;  %v897_v58 = vadd.f32 %v896_v3, %v895_v5 }
 0x1a1   : > { %741 = vst [vmem:[%s231_s22 + $0x8] sm:$0xff] %v897_v58 }
 0x1a2   : > { %1054 = shalt.err (!%p1051_p9)
}
 0x1a3   : > { %s1055_s19 = scalar_lea.hbm %s1731_s27, 256  ;;  %s1059_s9 = scalar_lea.hbm %s1783_s3, 512 }
 0x1a4   : > { %p1056_p1 = scmp.ne.s32.totalorder %s1731_s27, %s1055_s19  ;;  %p1060_p3 = scmp.lt.u32.totalorder %s1731_s27, %s1783_s3 }
 0x1a5   : > { %p1061_p4 = scmp.lt.u32.totalorder %s1059_s9, %s1055_s19  ;;  %p1063_p6 = scmp.lt.u32.totalorder %s1055_s19, %s1731_s27 }
 0x1a6   : > { %p1057_p2 = pnand %p1056_p1, %p1249_p8 }
 0x1a7   : > { %p1062_p11 = por %p1061_p4, %p1060_p3 }
 0x1a8   : > { %p1058_p7 = pneg %p1057_p2 }
 0x1a9   : > { %p1064_p10 = por %p1063_p6, %p1062_p11 }
 0x1ab   : > { %p1065_p12 = pnand %p1064_p10, %p1058_p7 }
 0x1ad   : > { %1068 = shalt.err (!%p1065_p12)
}
 0x1ae   : > { %s1134_s22 = smov 128   ;;  %s1135_s25 = smov 256  }
 0x1af   : > { %s1136_s30 = smov 8  }
 0x1b0   : > { %908 = dma.vmem_to_hbm [thread:$0]  (%p1249_p8), %s1726_s10, 256, %s1731_s27, %s743_s5, %s1134_s22, %s1135_s25, %s1136_s30  }
 0x1b1 PF: > { %s773_s26 = sand.u32 1, %s1107_s12   ;;  %p1806_p13 = scmp.ne.s32.totalorder %s1791_s23, 0 }
 0x1b2   : > { %p1807_p0 = scmp.ge.s32.totalorder %s1127_s17, 2  ;;  %s774_s7 = scalar_lea.sflag [#allocation5], %s773_s26 }
 0x1b4   : > { %p919_p5 = pnand %p1807_p0, %p1806_p13 }
 0x1b6   : > { %1102 = dma.done.wait (!%p919_p5), %s774_s7, 256  }
 0x1b7   : > { %1104 = vsyncadd (!%p919_p5), %s774_s7, 4294967040  ;;  %s20_s17 = sadd.s32 1, %s1127_s17   ;;  %s1808_s12 = smov %s1111_s13 }
 0x1b8   : > { %p17_p9 = scmp.ge.s32.totalorder %s20_s17, 4   ;;  %s1809_s13 = smov %s1115_s14 }
 0x1b9   : > { %s1810_s14 = smov %s1258_s4  ;;  %s1811_s15 = smov %s1123_s16 }
 0x1ba   : > { %s1812_s16 = smov %s1814_s28  ;;  %19 = sbr.rel (!%p17_p9) target bundleno = 7 (0x7), region = 89 }
 0x1c1   :  { %779 = vsyncpa [#allocation4], 1 }
 0x1c2   :  { %781 = vsyncpa [#allocation4 + $0x1], 1 }
 0x1c3   :  { %782 = vsyncpa [#allocation7], 1 }
 0x1c4   :  { %783 = vsyncpa [#allocation5], 1 }
 0x1c5   :  { %785 = vsyncpa [#allocation5 + $0x1], 1 }

</bundles_post_ra>
